<compile_context>
chip_gen: v7x
topology: tpu7x:2x2x1
jax: 0.10.0
libtpu: 0.0.40
codegen_flags: <defaults>
</compile_context>

<pallas_src>
import math
from functools import partial

import jax
import jax.numpy as jnp
from jax.experimental import pallas as pl
from jax.experimental.pallas import tpu as pltpu


def _round_up(x, m):
    return ((x + m - 1) // m) * m


def _patch_proj_kernel(p_ref, w_ref, b_ref, o_ref):
    # p_ref: (tm, K) bf16   -- streamed M-tile of im2col patches (K not lane-padded)
    # w_ref: (K,  E) bf16   -- VMEM-resident projection weight
    # b_ref: (1,  E) f32    -- VMEM-resident bias
    # o_ref: (tm, E) f32
    acc = jnp.dot(p_ref[...], w_ref[...], preferred_element_type=jnp.float32)
    o_ref[...] = (acc + b_ref[...]).astype(o_ref.dtype)


def _make_patches_spec(tm, K, n_blocks):
    index_map = lambda i: (i, 0)
    if n_blocks >= 3:
        # Per-tile compute is tiny, so the pipeline is DMA-dominated; a third buffer
        # (< ~1 MiB VMEM even at tm=1024) helps hide DMA latency jitter.
        try:
            return pl.BlockSpec((tm, K), index_map, pipeline_mode=pl.Buffered(3))
        except (TypeError, AttributeError):
            pass
    return pl.BlockSpec((tm, K), index_map)


def _patch_proj(patches, w_kE, bias2d, *, tm):
    Mp, K = patches.shape
    E = w_kE.shape[1]
    assert Mp % tm == 0
    n_blocks = Mp // tm
    cost = pl.CostEstimate(
        flops=2 * Mp * K * E,
        transcendentals=0,
        bytes_accessed=(patches.size * patches.dtype.itemsize
                        + w_kE.size * w_kE.dtype.itemsize
                        + bias2d.size * bias2d.dtype.itemsize
                        + Mp * E * 4))
    return pl.pallas_call(
        _patch_proj_kernel,
        out_shape=jax.ShapeDtypeStruct((Mp, E), jnp.float32),
        grid_spec=pl.GridSpec(
            grid=(n_blocks,),
            in_specs=[
                _make_patches_spec(tm, K, n_blocks),       # stream M-tiles
                pl.BlockSpec((K, E), lambda i: (0, 0)),    # weight stays resident
                pl.BlockSpec((1, E), lambda i: (0, 0)),    # bias stays resident
            ],
            out_specs=pl.BlockSpec((tm, E), lambda i: (i, 0)),
        ),
        compiler_params=pltpu.CompilerParams(
            # M-tiles are fully independent -> shard across TensorCores (2x on v7x).
            dimension_semantics=("parallel",),
            # Allow XLA to fuse the im2col producer into the Mosaic input instead of
            # round-tripping a materialized patches tensor through HBM.
            allow_input_fusion=[True, False, False]),
        cost_estimate=cost,
    )(patches, w_kE, bias2d)


@partial(jax.jit,
         static_argnames=("ph", "pw", "sh", "sw", "ny", "nx", "embed_dim", "tm_max"))
def _patch_embed_forward(x, w_kE, bias2d, *, ph, pw, sh, sw, ny, nx,
                         embed_dim, tm_max):
    B, C, H, W = x.shape

    # --- im2col (matches NCHW strided-conv patch extraction semantics) ---
    row_idx = (jnp.arange(ny) * sh)[:, None] + jnp.arange(ph)[None, :]   # (ny, ph)
    col_idx = (jnp.arange(nx) * sw)[:, None] + jnp.arange(pw)[None, :]   # (nx, pw)
    xr = x[:, :, row_idx, :]                 # (B, C, ny, ph, W)
    xp = xr[:, :, :, :, col_idx]             # (B, C, ny, ph, nx, pw)
    patches = jnp.transpose(xp, (0, 2, 4, 1, 3, 5)).reshape(B * ny * nx, C * ph * pw)
    patches = patches.astype(jnp.bfloat16)   # (M, K) bf16 -- no K lane padding

    M, K = patches.shape
    # tm: multiple of 16 (bf16 sublane packing), capped at tm_max, and no larger than
    # ceil(M/2) rounded to 16 so the parallel grid has >= 2 steps whenever possible
    # (lets v7x's second TensorCore take half the work; harmless on v5e/v6e).
    tm = min(tm_max, max(16, _round_up(-(-M // 2), 16)))
    Mp = _round_up(M, tm)
    if Mp != M:
        patches = jnp.pad(patches, ((0, Mp - M), (0, 0)))   # zero rows, sliced off below

    out = _patch_proj(patches, w_kE, bias2d, tm=tm)          # (Mp, E) f32
    return out[:M].reshape(B, ny * nx, embed_dim)


class PatchEmbedOverlap:
    """JAX/Pallas port of PatchEmbed_overlap (overlapping patch embedding)."""

    def __init__(self, img_size=16, patch_size=6, stride_size=5,
                 in_chans=4, embed_dim=32, key=None, tm=1024):
        to2 = lambda v: (v, v) if isinstance(v, int) else tuple(v)
        self.img_size = to2(img_size)
        self.patch_size = to2(patch_size)
        self.stride_size = to2(stride_size)
        self.in_chans = in_chans
        self.embed_dim = embed_dim
        self.num_y = (self.img_size[0] - self.patch_size[0]) // self.stride_size[0] + 1
        self.num_x = (self.img_size[1] - self.patch_size[1]) // self.stride_size[1] + 1
        self.num_patches = self.num_y * self.num_x
        # tm=1024 double-buffered: patches (1024 x K) bf16 + out (1024 x E) f32 + weight
        # stays far below even v7x's 64 MiB VMEM; tm is further capped per call.
        self.tm = tm
        print('using stride: {}, and patch number is num_y{} * num_x{}'.format(
            stride_size, self.num_y, self.num_x))

        if key is None:
            key = jax.random.PRNGKey(0)
        kw, kb = jax.random.split(key)
        ph, pw = self.patch_size
        # PyTorch: m.weight.data.normal_(0, sqrt(2 / (kh*kw*out_channels)))
        n = ph * pw * embed_dim
        self.weight = (jax.random.normal(kw, (embed_dim, in_chans, ph, pw), jnp.float32)
                       * math.sqrt(2.0 / n))
        # Conv2d bias keeps default init: U(-1/sqrt(fan_in), 1/sqrt(fan_in))
        fan_in = in_chans * ph * pw
        bound = 1.0 / math.sqrt(fan_in)
        self.bias = jax.random.uniform(kb, (embed_dim,), jnp.float32,
                                       minval=-bound, maxval=bound)

        # --- precompute kernel operands once (no K/E padding; see header) ---
        K = in_chans * ph * pw
        self.w_kE = self.weight.reshape(embed_dim, K).T.astype(jnp.bfloat16)  # (K, E) bf16
        self.bias2d = self.bias.reshape(1, embed_dim)                          # (1, E) f32

    def __call__(self, x):
        B, C, H, W = x.shape
        assert H == self.img_size[0] and W == self.img_size[1], (
            f"Input image size ({H}*{W}) doesn't match model "
            f"({self.img_size[0]}*{self.img_size[1]}).")
        return _patch_embed_forward(
            x, self.w_kE, self.bias2d,
            ph=self.patch_size[0], pw=self.patch_size[1],
            sh=self.stride_size[0], sw=self.stride_size[1],
            ny=self.num_y, nx=self.num_x,
            embed_dim=self.embed_dim, tm_max=self.tm)


if __name__ == "__main__":
    key = jax.random.PRNGKey(0)
    k_in, k_param = jax.random.split(key)

    B, C, H, W = 2, 4, 16, 16
    module = PatchEmbedOverlap(img_size=16, patch_size=6, stride_size=5,
                               in_chans=C, embed_dim=32, key=k_param)
    x = jax.random.normal(k_in, (B, C, H, W), jnp.float32)

    out = module(x)
    out = jax.block_until_ready(out)
    assert out.shape == (B, module.num_patches, module.embed_dim), out.shape

    # Reference: lax conv (same semantics as nn.Conv2d) with the same bf16 input rounding
    # the kernel uses for its matmul operands, f32 accumulation.
    x_bf = x.astype(jnp.bfloat16).astype(jnp.float32)
    w_bf = module.weight.astype(jnp.bfloat16).astype(jnp.float32)
    ref = jax.lax.conv_general_dilated(
        x_bf, w_bf, window_strides=module.stride_size, padding='VALID',
        dimension_numbers=('NCHW', 'OIHW', 'NCHW'),
        precision=jax.lax.Precision.HIGHEST)
    ref = ref + module.bias[None, :, None, None]
    ref = ref.reshape(B, module.embed_dim, -1).transpose(0, 2, 1)
    assert jnp.allclose(out, ref, atol=1e-3, rtol=1e-3), float(jnp.abs(out - ref).max())

    # Loose sanity check against the full-f32 conv (bounds the bf16 cast error).
    ref32 = jax.lax.conv_general_dilated(
        x, module.weight, window_strides=module.stride_size, padding='VALID',
        dimension_numbers=('NCHW', 'OIHW', 'NCHW'),
        precision=jax.lax.Precision.HIGHEST)
    ref32 = ref32 + module.bias[None, :, None, None]
    ref32 = ref32.reshape(B, module.embed_dim, -1).transpose(0, 2, 1)
    assert jnp.allclose(out, ref32, atol=5e-2, rtol=5e-2)

    print("KERNEL_OK")
</pallas_src>

<mosaic_0001>
module attributes {stable_mosaic.version = 11 : i64} {
  func.func @_patch_proj_kernel(%arg0: i32, %arg1: memref<16x144xbf16, #tpu.memory_space<vmem>>, %arg2: memref<144x32xbf16, #tpu.memory_space<vmem>>, %arg3: memref<1x32xf32, #tpu.memory_space<vmem>>, %arg4: memref<16x32xf32, #tpu.memory_space<vmem>>) attributes {dimension_semantics = [#tpu.dimension_semantics<parallel>], iteration_bounds = array<i64: 2>, scalar_prefetch = 0 : i64, scratch_operands = 0 : i64, tpu.core_type = #tpu.core_type<tc>, window_params = [{transform_indices = @transform_0, window_bounds = array<i64: 16, 144>}, {pipeline_mode = #tpu.pipeline_mode<synchronous>, transform_indices = @transform_1, window_bounds = array<i64: 144, 32>}, {pipeline_mode = #tpu.pipeline_mode<synchronous>, transform_indices = @transform_2, window_bounds = array<i64: 1, 32>}, {transform_indices = @transform_3, window_bounds = array<i64: 16, 32>}]} {
    %c0 = arith.constant 0 : index
    %c0_0 = arith.constant 0 : index
    %0 = vector.load %arg1[%c0, %c0_0] : memref<16x144xbf16, #tpu.memory_space<vmem>>, vector<16x144xbf16>
    %c0_1 = arith.constant 0 : index
    %c0_2 = arith.constant 0 : index
    %1 = vector.load %arg2[%c0_1, %c0_2] : memref<144x32xbf16, #tpu.memory_space<vmem>>, vector<144x32xbf16>
    %cst = arith.constant dense<0.000000e+00> : vector<16x32xf32>
    %2 = tpu.matmul %0, %1, %cst {dimension_numbers = #tpu.dot_dimension_numbers<[1], [0], [0], [1], [0, 0, 1, 1], [], []>} : vector<16x144xbf16>, vector<144x32xbf16>, vector<16x32xf32> -> vector<16x32xf32>
    %c0_3 = arith.constant 0 : index
    %c0_4 = arith.constant 0 : index
    %3 = vector.load %arg3[%c0_3, %c0_4] : memref<1x32xf32, #tpu.memory_space<vmem>>, vector<1x32xf32>
    %4 = vector.broadcast %3 : vector<1x32xf32> to vector<16x32xf32>
    %5 = arith.addf %2, %4 : vector<16x32xf32>
    %c0_5 = arith.constant 0 : index
    %c0_6 = arith.constant 0 : index
    %6 = vector.load %arg4[%c0_5, %c0_6] : memref<16x32xf32, #tpu.memory_space<vmem>>, vector<16x32xf32>
    tpu.vector_store %arg4[%c0_5, %c0_6], %5 {strides = array<i32>} : memref<16x32xf32, #tpu.memory_space<vmem>>, vector<16x32xf32>,
    return
  }
  func.func @transform_0(%arg0: i32) -> (i32, i32) {
    %c0_i32 = arith.constant 0 : i32
    %c0_i32_0 = arith.constant 0 : i32
    return %arg0, %c0_i32 : i32, i32
  }
  func.func @transform_1(%arg0: i32) -> (i32, i32) {
    %c0_i32 = arith.constant 0 : i32
    %c0_i32_0 = arith.constant 0 : i32
    %c0_i32_1 = arith.constant 0 : i32
    return %c0_i32, %c0_i32_0 : i32, i32
  }
  func.func @transform_2(%arg0: i32) -> (i32, i32) {
    %c0_i32 = arith.constant 0 : i32
    %c0_i32_0 = arith.constant 0 : i32
    %c0_i32_1 = arith.constant 0 : i32
    return %c0_i32, %c0_i32_0 : i32, i32
  }
  func.func @transform_3(%arg0: i32) -> (i32, i32) {
    %c0_i32 = arith.constant 0 : i32
    %c0_i32_0 = arith.constant 0 : i32
    return %arg0, %c0_i32 : i32, i32
  }
}

</mosaic_0001>

<bundles_post_ra>
// kernel: _patch_embed_forward.2
= control target key start
LH: loop header
LB: loop body
LE: loop exit
PB: predicated region body
PF: predicated region fallthrough
CT: control target
= control target key end

     0   :  { %s655_s17 = smov 0   ;;  %s751_s0 = inlined_call_operand.vmem [shape: bf16[144,32], index: 0, kind: input, shape index: {}]   ;;  %s752_s1 = inlined_call_operand.vmem [shape: f32[1,32], index: 1, kind: input, shape index: {}]   ;;  %s753_s2 = inlined_call_operand.vmem [shape: bf16[18,144], index: 2, kind: input, shape index: {}]   ;;  %s754_s3 = inlined_call_operand.<no memory space> [shape: bf16[], index: 3, kind: input, shape index: {}]   ;;  %s755_s4 = inlined_call_operand.vmem [shape: f32[32,32], index: 4, kind: output, shape index: {}]  }
   0x1   :  { %v9_v0 = vstv %s754_s3 }
   0x2   :  { %v653_v1 = vunpack.i.l.bf16 %v9_v0 }
   0x3 LB: > { %s551_s18 = sadd.s32 4294967295, %s621_s17   ;;  %p555_p0 = scmp.ge.s32.totalorder %s621_s17, 1  ;;  %s621_s17 = sphi %s655_s17, %s19_s17  }
   0x4   : > { %p155_p1 = scmp.lt.s32.totalorder %s621_s17, 3 }
   0x6   : > { %p156_p2 = pnand %p555_p0, %p155_p1 }
   0x8   : > { %159 = sbr.rel (%p156_p2) target bundleno = 276 (0x114), region = 32 }
   0xf   : > { %v603_v2 = vld [vmem:[%s751_s0] sm:$0xff]   ;;  %v623_v3 = vmov 0   ;;  %s667_s3 = sshll.u32 %s551_s18, 1  ;;  %v604_v4 = vld [vmem:[%s751_s0 + $0x8] sm:$0xff]   ;;  %v605_v5 = vld [vmem:[%s751_s0 + $0x10] sm:$0xff]   ;;  %v228_v6 = vlaneseq  ;;  %s687_s6 = sshll.u32 %s551_s18, 4 }
  0x10   : > { %451 = vmatprep.subr.bf16.mxu0 %v623_v3  ;;  %s208_s23 = ssub.s32 2, %s667_s3  ;;  %p191_p3 = scmp.lt.s32.totalorder %s667_s3, 2  ;;  %v606_v7 = vld [vmem:[%s751_s0 + $0x18] sm:$0xff]   ;;  %v607_v9 = vld [vmem:[%s751_s0 + $0x20] sm:$0xff]   ;;  %v230_v10 = vstv %s687_s6  ;;  %v608_v14 = vld [vmem:[%s751_s0 + $0x28] sm:$0xff]   ;;  %v624_v25 = vmov 0.0  }
  0x11   : > { %452 = vmatpush1.bf16.msra.mxu0 %v603_v2  ;;  %p209_p4 = scmp.lt.s32.totalorder %s208_s23, 0  ;;  %s279_s30 = sadd.s32 1, %s667_s3  ;;  %v229_v8 = vshrl.u32 %v228_v6, 7  ;;  %v270_v11 = vand.u32 127, %v228_v6  ;;  %v224_v12 = vstv %s208_s23  ;;  %v609_v20 = vld [vmem:[%s751_s0 + $0x30] sm:$0xff]   ;;  %v610_v29 = vld [vmem:[%s751_s0 + $0x38] sm:$0xff]  }
  0x12   : > { %453 = vmatprep.subr.bf16.mxu0 %v623_v3  ;;  %s192_s26 = scalar_select %p191_p3, %s667_s3, 2  ;;  %vm225_vm0 = vcmp.lt.s32.totalorder %v224_v12, 0  ;;  %v611_v33 = vld [vmem:[%s751_s0 + $0x40] sm:$0xff]   ;;  %vm447_vm5 = vcmask 130048   ;;  %vm492_vm6 = vcmask 261120  }
  0x13   : > { %s210_s27 = scalar_select %p209_p4, 0, 255  ;;  %v231_v13 = vadd.s32 %v230_v10, %v229_v8  ;;  %v271_v15 = vadd.s32 128, %v270_v11  ;;  %v569_v47 = vld [vmem:[%s752_s1] ss:$0 sm:$0xff] }
  0x14   : > { %s689_s9 = ssub.s32 2, %s279_s30  ;;  %s584_s12 = sshll.u32 %s192_s26, 3 }
  0x15   : > { %454 = vmatpush1.bf16.msra.mxu0 %v604_v4  ;;  %s211_s5 = sshrl.u32 %s210_s27, 1  ;;  %p281_p5 = scmp.lt.s32.totalorder %s689_s9, 0  ;;  %vm232_vm1 = vcmp.lt.s32.totalorder %v231_v13, 18  ;;  %vm272_vm2 = vcmp.lt.s32.totalorder %v271_v15, 144  ;;  %v297_v31 = vstv %s689_s9 }
  0x16   : > { %455 = vmatprep.subr.bf16.mxu0 %v623_v3  ;;  %s212_s7 = sor.u32 %s211_s5, %s210_s27  ;;  %s700_s19 = scalar_lea.vmem %s753_s2, %s584_s12  ;;  %vm298_vm3 = vcmp.lt.s32.totalorder %v297_v31, 0 }
  0x17   : > { %s213_s8 = sand.u32 85, %s212_s7  ;;  %s588_s29 = sadd.s32 8, %s687_s6 }
  0x18   : > { %s214_s13 = sshrl.u32 %s213_s8, 1  ;;  %v304_v28 = vstv %s588_s29  ;;  %p203_p6 = scmp.lt.s32.totalorder %s667_s3, 3 }
  0x19   : > { %456 = vmatpush1.bf16.msra.mxu0 %v605_v5  ;;  %s215_s14 = sor.u32 %s214_s13, %s213_s8  ;;  %v305_v32 = vadd.s32 %v304_v28, %v229_v8 }
  0x1a   : > { %457 = vmatprep.subr.bf16.mxu0 %v623_v3  ;;  %s216_s15 = sand.u32 51, %s215_s14  ;;  %s757_s3 = smov (!%p203_p6, %s667_s3), 3 }
  0x1b   : > { %s217_s20 = sshrl.u32 %s216_s15, 2  ;;  %vm306_vm4 = vcmp.lt.s32.totalorder %v305_v32, 18  ;;  %s561_s9 = sshll.u32 %s757_s3, 3 }
  0x1c   : > { %s218_s24 = sor.u32 %s217_s20, %s216_s15  ;;  %s206_s22 = scalar_lea.vmem %s755_s4, %s561_s9 }
  0x1d   : > { %458 = vmatpush1.bf16.msra.mxu0 %v606_v7  ;;  %s219_s25 = sand.u32 15, %s218_s24 }
  0x1e   : > { %459 = vmatprep.subr.bf16.mxu0 %v623_v3  ;;  %v220_v16 = vld [vmem:[%s700_s19] sm:%s219_s25]  ;;  %s282_s26 = scalar_select %p281_p5, 0, 255 }
  0x1f   : > { %v563_v17 = vld [vmem:[%s700_s19 + $0x4] sm:%s219_s25]  ;;  %v221_v18 = vunpack.c.l.bf16 %v220_v16 }
  0x20   : > { %v256_v19 = vunpack.c.l.bf16 %v563_v17  ;;  %s283_s28 = sshrl.u32 %s282_s26, 1 }
  0x21   : > { %460 = vmatpush1.bf16.msra.mxu0 %v607_v9  ;;  %v226_v21 = vsel %vm225_vm0, %v653_v1, %v221_v18  ;;  %s284_s30 = sor.u32 %s283_s28, %s282_s26 }
  0x22   : > { %461 = vmatprep.subr.bf16.mxu0 %v623_v3  ;;  %v261_v22 = vsel %vm225_vm0, %v653_v1, %v256_v19  ;;  %v233_v23 = vsel %vm232_vm1, %v226_v21, %v653_v1  ;;  %s285_s5 = sand.u32 85, %s284_s30 }
  0x23   : > { %v268_v24 = vsel %vm232_vm1, %v261_v22, %v653_v1  ;;  %v239_v26 = vpack.c.bf16 %v624_v25, %v233_v23  ;;  %s286_s7 = sshrl.u32 %s285_s5, 1 }
  0x24   : > { %v273_v27 = vsel %vm272_vm2, %v268_v24, %v653_v1  ;;  %s287_s10 = sor.u32 %s286_s7, %s285_s5 }
  0x25   : > { %462 = vmatpush1.bf16.msra.mxu0 %v608_v14  ;;  %v275_v30 = vpack.c.bf16 %v624_v25, %v273_v27  ;;  %241 = vst [vmem:[#allocation7] sm:$0xf] %v239_v26  ;;  %s288_s11 = sand.u32 51, %s287_s10 }
  0x26   : > { %463 = vmatprep.subr.bf16.mxu0 %v623_v3  ;;  %s289_s12 = sshrl.u32 %s288_s11, 2 }
  0x27   : > { %277 = vst [vmem:[#allocation7 + $0x4] sm:$0xf] %v275_v30  ;;  %s290_s13 = sor.u32 %s289_s12, %s288_s11 }
  0x28   : > { %s291_s16 = sand.u32 15, %s290_s13 }
  0x29   : > { %464 = vmatpush1.bf16.msra.mxu0 %v609_v20  ;;  %v565_v34 = vld [vmem:[%s700_s19 + $0x8] sm:%s291_s16] }
  0x2a   : > { %465 = vmatprep.subr.bf16.mxu0 %v623_v3  ;;  %v567_v35 = vld [vmem:[%s700_s19 + $0xc] sm:%s291_s16]  ;;  %v293_v36 = vunpack.c.l.bf16 %v565_v34 }
  0x2b   : > { %v332_v37 = vunpack.c.l.bf16 %v567_v35 }
  0x2c   : > { %v299_v38 = vsel %vm298_vm3, %v653_v1, %v293_v36 }
  0x2d   : > { %466 = vmatpush1.bf16.msra.mxu0 %v610_v29  ;;  %v338_v39 = vsel %vm298_vm3, %v653_v1, %v332_v37  ;;  %v307_v40 = vsel %vm306_vm4, %v299_v38, %v653_v1 }
  0x2e   : > { %467 = vmatprep.subr.bf16.mxu0 %v623_v3  ;;  %v346_v41 = vsel %vm306_vm4, %v338_v39, %v653_v1  ;;  %v314_v42 = vpack.c.bf16 %v624_v25, %v307_v40 }
  0x2f   : > { %v351_v43 = vsel %vm272_vm2, %v346_v41, %v653_v1 }
  0x30   : > { %v353_v44 = vpack.c.bf16 %v624_v25, %v351_v43  ;;  %316 = vst [vmem:[#allocation7 + $0x8] sm:$0xf] %v314_v42 }
  0x31   : > { %468 = vmatpush1.bf16.msra.mxu0 %v611_v33 }
  0x32   : > { %355 = vst [vmem:[#allocation7 + $0xc] sm:$0xf] %v353_v44 }
  0x37   : > { %v612_v45 = vld [vmem:[#allocation7] ss:$8 sps:$4 sm:$0xff]  }
  0x39   : > { %v614_v46 = vld [vmem:[#allocation7 + $0x4] ss:$8 sps:$4 sm:$0xff]  }
  0x3a   : > { %581 = vmatprep.mubr.msk.bf16.mxu0 %vm447_vm5, %v614_v46 }
  0x3b   : > { %484 = vmatmul.mubr.bf16.vlgmr.msra.gmra.mrb[0].mxu0 %v612_v45 }
 0x10e   : > { %v485_v48 = vpop.f32.mrb[0].mxu0 }
 0x10f   : > { %v486_v49 = vadd.f32 %v569_v47, %v485_v48  ;;  %v487_v50 = vpop.f32.mrb[1].mxu0 }
 0x110   : > { %v488_v51 = vpop.f32.mrb[2].mxu0 }
 0x111   : > { %493 = vst.msk [vmem:[%s206_s22] sm:$0xff] %vm492_vm6, %v486_v49  ;;  %v489_v52 = vadd.f32 %v569_v47, %v488_v51  ;;  %v490_v53 = vpop.f32.mrb[3].mxu0 }
 0x113   : > { %494 = vst.msk [vmem:[%s206_s22 + $0x8] sm:$0xff] %vm492_vm6, %v489_v52 }
 0x114 PF: > { %s19_s17 = sadd.s32 1, %s621_s17  }
 0x115   : > { %p16_p7 = scmp.ge.s32.totalorder %s19_s17, 4  }
 0x117   :  { %18 = sbr.rel (!%p16_p7) target bundleno = 3 (0x3), region = 68 }

</bundles_post_ra>
